<compile_context>
chip_gen: v7x
topology: tpu7x:2x2x1
jax: 0.10.0
libtpu: 0.0.40
codegen_flags: <defaults>
</compile_context>

<pallas_src>
import jax
import jax.numpy as jnp
from jax.experimental import pallas as pl

LEAKY_SLOPE = 0.01   # nn.LeakyReLU default
BN_EPS = 1e-5        # nn.BatchNorm1d default


def _leaky_relu(x):
    return jnp.where(x > 0, x, LEAKY_SLOPE * x)


def _round_up(n, m):
    return ((n + m - 1) // m) * m


def _lane_width(n):
    """Lane width of the packed parameter slab (power of two, >= 8)."""
    if n <= 128:
        return max(8, pl.next_power_of_2(n))
    return _round_up(n, 128)


def _make_kernel(batch, ka, lw, r_aux1, r_w2, r_aux2):
    """Kernel specialized (via closure) to the packed-slab row layout."""
    inv_b = 1.0 / batch   # static batch size (training-mode BN)

    def kernel(x_ref, p_ref, out_ref):
        # ---- layer 1: augmented matmul (b1 is row `in_f` of the W1 block) ----
        h = jnp.dot(x_ref[...], p_ref[0:ka, :],
                    preferred_element_type=jnp.float32)            # (B, LW)
        h = _leaky_relu(h)
        # One fused sublane reduction for both BN statistics (sum, sum-of-sq).
        stats = jnp.sum(jnp.concatenate([h, h * h], axis=-1),
                        axis=0, keepdims=True)                      # (1, 2*LW)
        mean = stats[:, :lw] * inv_b
        var = stats[:, lw:] * inv_b - mean * mean                   # biased var
        gamma1 = p_ref[r_aux1:r_aux1 + 1, :]                        # (1, LW)
        beta1 = p_ref[r_aux1 + 1:r_aux1 + 2, :]
        scale = jax.lax.rsqrt(var + BN_EPS) * gamma1                # fold gamma
        h = h * scale + (beta1 - mean * scale)                      # one pass

        # ---- layer 2: Linear -> LeakyReLU -> (BN + sigmoid head, folded) ----
        h = jnp.dot(h, p_ref[r_w2:r_w2 + lw, :],
                    preferred_element_type=jnp.float32)             # (B, LW)
        h = _leaky_relu(h + p_ref[r_aux2:r_aux2 + 1, :])            # + b2
        stats = jnp.sum(jnp.concatenate([h, h * h], axis=-1),
                        axis=0, keepdims=True)
        mean = stats[:, :lw] * inv_b
        var = stats[:, lw:] * inv_b - mean * mean
        # Head fold: BN2 affine and w3/b3 collapse into one per-lane scale and
        # a single lane reduction -- BN2 output is never materialized and the
        # N=1 matmul is replaced by a VPU multiply + XLU lane reduce.
        gw = p_ref[r_aux2 + 1:r_aux2 + 2, :]                        # gamma2 * w3
        c = jax.lax.rsqrt(var + BN_EPS) * gw
        y = jnp.sum((h - mean) * c, axis=-1, keepdims=True)         # (B, 1)
        y = y + p_ref[r_aux2 + 2:r_aux2 + 3, 0:1]                   # + sum(beta2*w3)+b3
        out_ref[...] = 0.5 * (jnp.tanh(0.5 * y) + 1.0)              # stable sigmoid

    return kernel


def pack_inputs(x, params):
    """Pack the 10 PyTorch-shaped parameters + input into 2 kernel operands.

    In real use the parameter slab would be packed once and reused across calls.
    """
    (w1, b1, g1, be1, w2, b2, g2, be2, w3, b3) = params
    in_f, h1 = w1.shape
    h2 = w2.shape[1]
    batch = x.shape[0]

    ka = _round_up(in_f + 1, 8)            # augmented K: [x | 1 | zero pad]
    lw = _lane_width(max(h1, h2))          # shared lane width of the slab
    r_aux1 = ka                            # gamma1 / beta1 rows
    r_w2 = ka + 8                          # layer-2 weight block (lw rows)
    r_aux2 = r_w2 + lw                     # b2 / gamma2*w3 / folded scalar
    rows = r_aux2 + 8

    p = jnp.zeros((rows, lw), jnp.float32)
    p = p.at[0:in_f, 0:h1].set(w1)                              # W1
    p = p.at[in_f, 0:h1].set(b1[0])                             # b1 (matmul-folded)
    p = p.at[r_aux1, 0:h1].set(g1[0])                           # gamma1
    p = p.at[r_aux1 + 1, 0:h1].set(be1[0])                      # beta1
    p = p.at[r_w2:r_w2 + h1, 0:h2].set(w2)                      # W2
    p = p.at[r_aux2, 0:h2].set(b2[0])                           # b2
    p = p.at[r_aux2 + 1, 0:h2].set(g2[0] * w3[:, 0])            # gamma2 * w3
    p = p.at[r_aux2 + 2, 0].set(jnp.sum(be2[0] * w3[:, 0]) + b3[0, 0])

    x_aug = jnp.zeros((batch, ka), jnp.float32)
    x_aug = x_aug.at[:, 0:in_f].set(x)
    x_aug = x_aug.at[:, in_f].set(1.0)                          # ones column -> b1

    layout = dict(batch=batch, ka=ka, lw=lw,
                  r_aux1=r_aux1, r_w2=r_w2, r_aux2=r_aux2)
    return x_aug, p, layout


def net_forward(x, params):
    assert len(params) == 10, "kernel specializes hidden_layer_sizes of length 2"
    assert params[-2].shape[1] == 1, "kernel specializes the output_size==1 (sigmoid) head"
    assert x.shape[0] > 1, "training-mode BatchNorm path (PyTorch uses eval stats at B==1)"

    x_aug, p, layout = pack_inputs(x, params)
    batch, ka, lw = layout["batch"], layout["ka"], layout["lw"]

    cost = pl.CostEstimate(
        flops=2 * batch * (ka * lw + lw * lw + lw) + 16 * batch * lw,
        transcendentals=batch + 2 * lw,
        bytes_accessed=int(x_aug.size + p.size + batch) * 4,
    )

    kernel = _make_kernel(**layout)
    full = lambda a: pl.BlockSpec(a.shape, lambda: (0,) * a.ndim)

    return pl.pallas_call(
        kernel,
        out_shape=jax.ShapeDtypeStruct((batch, 1), jnp.float32),
        grid=(),
        in_specs=[full(x_aug), full(p)],
        out_specs=pl.BlockSpec((batch, 1), lambda: (0, 0)),
        cost_estimate=cost,
    )(x_aug, p)


def init_params(key, in_features, hidden_sizes, output_size):
    """Deterministic synthetic parameter init (PyTorch-like uniform ranges)."""
    params = []
    fan_in = in_features
    keys = jax.random.split(key, len(hidden_sizes) + 1)
    for i, size in enumerate(hidden_sizes):
        bound = 1.0 / jnp.sqrt(fan_in)
        kw, kb = jax.random.split(keys[i])
        W = jax.random.uniform(kw, (fan_in, size), jnp.float32, -bound, bound)
        b = jax.random.uniform(kb, (1, size), jnp.float32, -bound, bound)
        gamma = jnp.ones((1, size), jnp.float32)   # BatchNorm1d weight init
        beta = jnp.zeros((1, size), jnp.float32)   # BatchNorm1d bias init
        params += [W, b, gamma, beta]
        fan_in = size
    bound = 1.0 / jnp.sqrt(fan_in)
    kw, kb = jax.random.split(keys[-1])
    W = jax.random.uniform(kw, (fan_in, output_size), jnp.float32, -bound, bound)
    b = jax.random.uniform(kb, (1, output_size), jnp.float32, -bound, bound)
    params += [W, b]
    return tuple(params)


def reference_forward(x, params):
    """Plain-JAX reference (two-pass BN, faithful to PyTorch semantics)."""
    (w1, b1, g1, be1, w2, b2, g2, be2, w3, b3) = params

    def bn(h, gamma, beta):
        mean = jnp.mean(h, axis=0, keepdims=True)
        var = jnp.mean((h - mean) ** 2, axis=0, keepdims=True)
        return (h - mean) * jax.lax.rsqrt(var + BN_EPS) * gamma + beta

    h = bn(_leaky_relu(x @ w1 + b1), g1, be1)
    h = bn(_leaky_relu(h @ w2 + b2), g2, be2)
    return jax.nn.sigmoid(h @ w3 + b3)


if __name__ == "__main__":
    B = 8                      # batch > 1 so BatchNorm stays in training mode
    IN_FEATURES = 32           # LazyLinear infers this from the input
    HIDDEN = (32, 64)
    OUTPUT_SIZE = 1            # -> sigmoid head

    key = jax.random.PRNGKey(0)
    kx, kp = jax.random.split(key)
    x = jax.random.normal(kx, (B, IN_FEATURES), dtype=jnp.float32)
    params = init_params(kp, IN_FEATURES, HIDDEN, OUTPUT_SIZE)

    out = net_forward(x, params)
    out = jax.block_until_ready(out)

    ref = reference_forward(x, params)
    assert out.shape == (B, OUTPUT_SIZE)
    assert jnp.allclose(out, ref, atol=3e-5, rtol=1e-4), (
        float(jnp.max(jnp.abs(out - ref))))

    print("KERNEL_OK")
</pallas_src>

<mosaic_0001>
module attributes {stable_mosaic.version = 11 : i64} {
  func.func @kernel(%arg0: memref<8x40xf32, #tpu.memory_space<vmem>>, %arg1: memref<120x64xf32, #tpu.memory_space<vmem>>, %arg2: memref<8x1xf32, #tpu.memory_space<vmem>>) attributes {dimension_semantics = [], scalar_prefetch = 0 : i64, scratch_operands = 0 : i64, tpu.core_type = #tpu.core_type<tc>} {
    %c0 = arith.constant 0 : index
    %c0_0 = arith.constant 0 : index
    %0 = vector.load %arg0[%c0, %c0_0] : memref<8x40xf32, #tpu.memory_space<vmem>>, vector<8x40xf32>
    %c0_1 = arith.constant 0 : index
    %c0_2 = arith.constant 0 : index
    %1 = vector.load %arg1[%c0_1, %c0_2] : memref<120x64xf32, #tpu.memory_space<vmem>>, vector<40x64xf32>
    %cst = arith.constant dense<0.000000e+00> : vector<8x64xf32>
    %2 = tpu.matmul %0, %1, %cst {dimension_numbers = #tpu.dot_dimension_numbers<[1], [0], [0], [1], [0, 0, 1, 1], [], []>} : vector<8x40xf32>, vector<40x64xf32>, vector<8x64xf32> -> vector<8x64xf32>
    %cst_3 = arith.constant 0.000000e+00 : f32
    %3 = vector.broadcast %cst_3 : f32 to vector<8x64xf32>
    %4 = arith.cmpf ogt, %2, %3 : vector<8x64xf32>
    %cst_4 = arith.constant 0.00999999977 : f32
    %5 = vector.broadcast %cst_4 : f32 to vector<8x64xf32>
    %6 = arith.mulf %5, %2 : vector<8x64xf32>
    %7 = arith.select %4, %2, %6 : vector<8x64xi1>, vector<8x64xf32>
    %8 = arith.mulf %7, %7 : vector<8x64xf32>
    %9 = tpu.concatenate %7, %8 in 1 : vector<8x64xf32>, vector<8x64xf32> -> vector<8x128xf32>
    %cst_5 = arith.constant dense<0.000000e+00> : vector<128xf32>
    %10 = vector.multi_reduction <add>, %9, %cst_5 [0] : vector<8x128xf32> to vector<128xf32>
    %11 = vector.shape_cast %10 : vector<128xf32> to vector<1x128xf32>
    %12 = vector.extract_strided_slice %11 {offsets = [0, 0], sizes = [1, 64], strides = [1, 1]} : vector<1x128xf32> to vector<1x64xf32>
    %cst_6 = arith.constant 1.250000e-01 : f32
    %13 = vector.broadcast %cst_6 : f32 to vector<1x64xf32>
    %14 = arith.mulf %12, %13 : vector<1x64xf32>
    %15 = vector.extract_strided_slice %11 {offsets = [0, 64], sizes = [1, 64], strides = [1, 1]} : vector<1x128xf32> to vector<1x64xf32>
    %cst_7 = arith.constant 1.250000e-01 : f32
    %16 = vector.broadcast %cst_7 : f32 to vector<1x64xf32>
    %17 = arith.mulf %15, %16 : vector<1x64xf32>
    %18 = arith.mulf %14, %14 : vector<1x64xf32>
    %19 = arith.subf %17, %18 : vector<1x64xf32>
    %c40 = arith.constant 40 : index
    %c0_8 = arith.constant 0 : index
    %20 = vector.load %arg1[%c40, %c0_8] : memref<120x64xf32, #tpu.memory_space<vmem>>, vector<1x64xf32>
    %c41 = arith.constant 41 : index
    %c0_9 = arith.constant 0 : index
    %21 = vector.load %arg1[%c41, %c0_9] : memref<120x64xf32, #tpu.memory_space<vmem>>, vector<1x64xf32>
    %cst_10 = arith.constant 9.99999974E-6 : f32
    %22 = vector.broadcast %cst_10 : f32 to vector<1x64xf32>
    %23 = arith.addf %19, %22 : vector<1x64xf32>
    %24 = math.rsqrt %23 : vector<1x64xf32>
    %25 = arith.mulf %24, %20 : vector<1x64xf32>
    %26 = vector.broadcast %25 : vector<1x64xf32> to vector<8x64xf32>
    %27 = arith.mulf %7, %26 : vector<8x64xf32>
    %28 = arith.mulf %14, %25 : vector<1x64xf32>
    %29 = arith.subf %21, %28 : vector<1x64xf32>
    %30 = vector.broadcast %29 : vector<1x64xf32> to vector<8x64xf32>
    %31 = arith.addf %27, %30 : vector<8x64xf32>
    %c48 = arith.constant 48 : index
    %c0_11 = arith.constant 0 : index
    %32 = vector.load %arg1[%c48, %c0_11] : memref<120x64xf32, #tpu.memory_space<vmem>>, vector<64x64xf32>
    %cst_12 = arith.constant dense<0.000000e+00> : vector<8x64xf32>
    %33 = tpu.matmul %31, %32, %cst_12 {dimension_numbers = #tpu.dot_dimension_numbers<[1], [0], [0], [1], [0, 0, 1, 1], [], []>} : vector<8x64xf32>, vector<64x64xf32>, vector<8x64xf32> -> vector<8x64xf32>
    %c112 = arith.constant 112 : index
    %c0_13 = arith.constant 0 : index
    %34 = vector.load %arg1[%c112, %c0_13] : memref<120x64xf32, #tpu.memory_space<vmem>>, vector<1x64xf32>
    %35 = vector.broadcast %34 : vector<1x64xf32> to vector<8x64xf32>
    %36 = arith.addf %33, %35 : vector<8x64xf32>
    %cst_14 = arith.constant 0.000000e+00 : f32
    %37 = vector.broadcast %cst_14 : f32 to vector<8x64xf32>
    %38 = arith.cmpf ogt, %36, %37 : vector<8x64xf32>
    %cst_15 = arith.constant 0.00999999977 : f32
    %39 = vector.broadcast %cst_15 : f32 to vector<8x64xf32>
    %40 = arith.mulf %39, %36 : vector<8x64xf32>
    %41 = arith.select %38, %36, %40 : vector<8x64xi1>, vector<8x64xf32>
    %42 = arith.mulf %41, %41 : vector<8x64xf32>
    %43 = tpu.concatenate %41, %42 in 1 : vector<8x64xf32>, vector<8x64xf32> -> vector<8x128xf32>
    %cst_16 = arith.constant dense<0.000000e+00> : vector<128xf32>
    %44 = vector.multi_reduction <add>, %43, %cst_16 [0] : vector<8x128xf32> to vector<128xf32>
    %45 = vector.shape_cast %44 : vector<128xf32> to vector<1x128xf32>
    %46 = vector.extract_strided_slice %45 {offsets = [0, 0], sizes = [1, 64], strides = [1, 1]} : vector<1x128xf32> to vector<1x64xf32>
    %cst_17 = arith.constant 1.250000e-01 : f32
    %47 = vector.broadcast %cst_17 : f32 to vector<1x64xf32>
    %48 = arith.mulf %46, %47 : vector<1x64xf32>
    %49 = vector.extract_strided_slice %45 {offsets = [0, 64], sizes = [1, 64], strides = [1, 1]} : vector<1x128xf32> to vector<1x64xf32>
    %cst_18 = arith.constant 1.250000e-01 : f32
    %50 = vector.broadcast %cst_18 : f32 to vector<1x64xf32>
    %51 = arith.mulf %49, %50 : vector<1x64xf32>
    %52 = arith.mulf %48, %48 : vector<1x64xf32>
    %53 = arith.subf %51, %52 : vector<1x64xf32>
    %c113 = arith.constant 113 : index
    %c0_19 = arith.constant 0 : index
    %54 = vector.load %arg1[%c113, %c0_19] : memref<120x64xf32, #tpu.memory_space<vmem>>, vector<1x64xf32>
    %cst_20 = arith.constant 9.99999974E-6 : f32
    %55 = vector.broadcast %cst_20 : f32 to vector<1x64xf32>
    %56 = arith.addf %53, %55 : vector<1x64xf32>
    %57 = math.rsqrt %56 : vector<1x64xf32>
    %58 = arith.mulf %57, %54 : vector<1x64xf32>
    %59 = vector.broadcast %48 : vector<1x64xf32> to vector<8x64xf32>
    %60 = arith.subf %41, %59 : vector<8x64xf32>
    %61 = vector.broadcast %58 : vector<1x64xf32> to vector<8x64xf32>
    %62 = arith.mulf %60, %61 : vector<8x64xf32>
    %cst_21 = arith.constant dense<0.000000e+00> : vector<8xf32>
    %63 = vector.multi_reduction <add>, %62, %cst_21 [1] : vector<8x64xf32> to vector<8xf32>
    %64 = vector.shape_cast %63 : vector<8xf32> to vector<8x1xf32>
    %c114 = arith.constant 114 : index
    %c0_22 = arith.constant 0 : index
    %65 = vector.load %arg1[%c114, %c0_22] : memref<120x64xf32, #tpu.memory_space<vmem>>, vector<1x1xf32>
    %66 = vector.broadcast %65 : vector<1x1xf32> to vector<8x1xf32>
    %67 = arith.addf %64, %66 : vector<8x1xf32>
    %cst_23 = arith.constant 5.000000e-01 : f32
    %68 = vector.broadcast %cst_23 : f32 to vector<8x1xf32>
    %69 = arith.mulf %68, %67 : vector<8x1xf32>
    %70 = math.tanh %69 : vector<8x1xf32>
    %cst_24 = arith.constant 1.000000e+00 : f32
    %71 = vector.broadcast %cst_24 : f32 to vector<8x1xf32>
    %72 = arith.addf %70, %71 : vector<8x1xf32>
    %cst_25 = arith.constant 5.000000e-01 : f32
    %73 = vector.broadcast %cst_25 : f32 to vector<8x1xf32>
    %74 = arith.mulf %73, %72 : vector<8x1xf32>
    %c0_26 = arith.constant 0 : index
    %c0_27 = arith.constant 0 : index
    %75 = vector.load %arg2[%c0_26, %c0_27] : memref<8x1xf32, #tpu.memory_space<vmem>>, vector<8x1xf32>
    tpu.vector_store %arg2[%c0_26, %c0_27], %74 {strides = array<i32>} : memref<8x1xf32, #tpu.memory_space<vmem>>, vector<8x1xf32>,
    return
  }
}

</mosaic_0001>

<bundles_post_ra>
// kernel: tpu_custom_call.1
= control target key start
LH: loop header
LB: loop body
LE: loop exit
PB: predicated region body
PF: predicated region fallthrough
CT: control target
= control target key end

     0   :  { %v367_v0 = vmov 0.0|0.0   ;;  %vm368_vm0 = vmmov 0   ;;  %v369_v4 = vmov 0.0   ;;  %vm17_vm1 = vcmask 326656   ;;  %s370_s21 = smov 64   ;;  %s465_s1 = inlined_call_operand.vmem [shape: f32[120,64], index: 1, kind: input, shape index: {}]   ;;  %s466_s0 = inlined_call_operand.vmem [shape: f32[8,40], index: 0, kind: input, shape index: {}]   ;;  %s467_s2 = inlined_call_operand.vmem [shape: f32[8,1], index: 2, kind: output, shape index: {}]  }
   0x1   :  { %339 = vmatprep.subr.bf16.mxu0 %v367_v0  ;;  %v12_v1 = vld [vmem:[%s465_s1] sm:$0xff]  ;;  %v13_v2 = vld [vmem:[%s465_s1 + $0x8] sm:$0xff]  ;;  %v14_v3 = vld [vmem:[%s465_s1 + $0x10] sm:$0xff]  ;;  %317 = vmatprep.mubr.msk.f32.mxu0 %vm368_vm0, %v369_v4  ;;  %vm99_vm3 = vcmask 523264   ;;  %v123_v38 = vlaneseq  ;;  %vm282_vm5 = vcmask 7168  }
   0x2   :  { %v340_v5 = vpack.c.bf16 %v13_v2, %v12_v1  ;;  %v15_v6 = vld [vmem:[%s465_s1 + $0x18] sm:$0xff]  ;;  %345 = vmatprep.subr.bf16.mxu1 %v367_v0  ;;  %336 = vmatprep.mubr.msk.f32.mxu1 %vm368_vm0, %v369_v4  ;;  %v16_v8 = vld [vmem:[%s465_s1 + $0x20] sm:$0xff]  ;;  %v114_v15 = vld [vmem:[%s465_s1 + $0x28] sm:$0x1] }
   0x3   :  { %v343_v7 = vpack.c.bf16 %v15_v6, %v14_v3  ;;  %v11_v9 = vld [vmem:[%s466_s0] sm:$0xff]  ;;  %119 = vrot.lane.b32.xlu1 %v114_v15, %s370_s21  ;;  %v143_v26 = vld [vmem:[%s465_s1 + $0x30] sm:$0xff]  ;;  %v144_v27 = vld [vmem:[%s465_s1 + $0x38] sm:$0xff]  ;;  %v124_v42 = vshrl.u32 %v123_v38, 7 }
   0x4   :  { %341 = vmatpush3.bf16.msra.mxu0 %v340_v5  ;;  %v145_v28 = vld [vmem:[%s465_s1 + $0x40] sm:$0xff]  ;;  %v346_v29 = vpack.c.bf16 %v144_v27, %v143_v26  ;;  %v146_v30 = vld [vmem:[%s465_s1 + $0x48] sm:$0xff]  ;;  %v147_v35 = vld [vmem:[%s465_s1 + $0x50] sm:$0xff] }
   0x5   :  { %342 = vmatprep.subr.bf16.mxu0 %v367_v0  ;;  %v349_v31 = vpack.c.bf16 %v146_v30, %v145_v28  ;;  %v148_v36 = vld [vmem:[%s465_s1 + $0x58] sm:$0xff]  ;;  %v149_v39 = vld [vmem:[%s465_s1 + $0x60] sm:$0xff]  ;;  %v150_v40 = vld [vmem:[%s465_s1 + $0x68] sm:$0xff]  ;;  %v125_v44 = vsub.s32 0, %v124_v42 }
   0x6   :  { %347 = vmatpush3.bf16.msra.mxu1 %v346_v29  ;;  %v352_v37 = vpack.c.bf16 %v148_v36, %v147_v35  ;;  %v355_v41 = vpack.c.bf16 %v150_v40, %v149_v39  ;;  %v115_v48 = vld [vmem:[%s465_s1 + $0x29] sm:$0x1]  ;;  %v289_v56 = vld [vmem:[%s465_s1 + $0x70] ss:$0 sm:$0xff]  ;;  %v251_v63 = vld [vmem:[%s465_s1 + $0x71] sm:$0x1] }
   0x7   :  { %348 = vmatprep.subr.bf16.mxu1 %v367_v0 }
   0x8   :  { %344 = vmatpush3.bf16.msra.mxu0 %v343_v7 }
   0x9   :  { %315 = vmatprep.subr.mxu0 %v369_v4 }
   0xa   :  { %350 = vmatpush3.bf16.msra.mxu1 %v349_v31 }
   0xb   :  { %351 = vmatprep.subr.bf16.mxu1 %v367_v0 }
   0xc   :  { %316 = vmatpush3.msra.mxu0 %v16_v8 }
   0xd   :  { %318 = vmatmul.mubr.msk.f32.vlgmr.msra.gmra.mrb[0].mxu0 %vm17_vm1, %v11_v9 }
   0xe   :  { %353 = vmatpush3.bf16.msra.mxu1 %v352_v37 }
   0xf   :  { %354 = vmatprep.subr.bf16.mxu1 %v367_v0 }
  0x12   :  { %356 = vmatpush3.bf16.msra.mxu1 %v355_v41 }
  0x75   :  { %v120_v43 = vpop.permute.xlu1 %119 }
  0xe0   :  { %v87_v10 = vpop.f32.mrb[0].mxu0 }
  0xe1   :  { %vm91_vm2 = vcmp.gt.f32.partialorder %v87_v10, 0.0  ;;  %v92_v11 = vmul.f32 0.01, %v87_v10  ;;  %v319_v12 = vpop.f32.mrb[1].mxu0 }
  0xe3   :  { %v93_v13 = vsel %vm91_vm2, %v87_v10, %v92_v11 }
  0xe4   :  { %v94_v14 = vmul.f32 %v93_v13, %v93_v13 }
  0xe6   :  { %96 = vrot.lane.b32.xlu0 %v94_v14, %s370_s21 }
 0x158   :  { %v97_v16 = vpop.permute.xlu0 %96 }
 0x159   :  { %v100_v17 = vsel %vm99_vm3, %v93_v13, %v97_v16 }
 0x15a   :  { %v101_v18 = vrot.slane %v100_v17, 4 }
 0x15c   :  { %v102_v19 = vadd.f32 %v101_v18, %v100_v17 }
 0x15e   :  { %v103_v20 = vrot.slane %v102_v19, 2 }
 0x160   :  { %v104_v21 = vadd.f32 %v103_v20, %v102_v19 }
 0x162   :  { %v105_v22 = vrot.slane %v104_v21, 1 }
 0x164   :  { %v106_v23 = vadd.f32 %v105_v22, %v104_v21  ;;  %v291_v21 = vld [vmem:[%s465_s1 + $0x72] ss:$0 sm:$0xff] }
 0x166   :  { %v107_v24 = vmul.f32 0.125, %v106_v23 }
 0x168   :  { %v108_v25 = vmul.f32 %v107_v24, %v107_v24 }
 0x16a   :  { %110 = vrot.lane.b32.xlu0 %v108_v25, %s370_s21 }
 0x1dc   :  { %v111_v32 = vpop.permute.xlu0 %110 }
 0x1dd   :  { %v113_v33 = vsub.f32 %v107_v24, %v111_v32 }
 0x1df   :  { %v116_v34 = vadd.f32 1e-05, %v113_v33 }
 0x1e1   :  { %361 = vrsqrt.f32 %v116_v34 }
 0x1eb   :  { %v362_v45 = vpop.eup %361 }
 0x1ec   :  { %v122_v46 = vmul.f32 %v362_v45, %v120_v43 }
 0x1ee   :  { %v126_v47 = vrot.slane %v122_v46, %v125_v44  ;;  %133 = vrot.lane.b32.xlu1 %v122_v46, %s370_s21 }
 0x1f0   :  { %128 = vrot.lane.b32.xlu0 %v126_v47, %s370_s21 }
 0x260   :  { %v134_v49 = vpop.permute.xlu1 %133 }
 0x261   :  { %v136_v50 = vmul.f32 %v134_v49, %v107_v24 }
 0x262   :  { %v129_v51 = vpop.permute.xlu0 %128 }
 0x263   :  { %v137_v52 = vsub.f32 %v115_v48, %v136_v50  ;;  %v131_v54 = vmul.f32 %v129_v51, %v93_v13 }
 0x265   :  { %v141_v53 = vrot.slane %v137_v52, %v125_v44 }
 0x267   :  { %v142_v55 = vadd.f32 %v141_v53, %v131_v54 }
 0x269   :  { %337 = vmatmul.mubr.msk.f32.vlgmr.msra.gmra.mrb[0].mxu1 %vm99_vm3, %v142_v55 }
 0x33c   :  { %v225_v57 = vpop.f32.mrb[0].mxu1 }
 0x33d   :  { %v226_v58 = vadd.f32 %v289_v56, %v225_v57  ;;  %v338_v59 = vpop.f32.mrb[1].mxu1 }
 0x33f   :  { %vm229_vm4 = vcmp.gt.f32.partialorder %v226_v58, 0.0  ;;  %v230_v60 = vmul.f32 0.01, %v226_v58 }
 0x341   :  { %v231_v61 = vsel %vm229_vm4, %v226_v58, %v230_v60 }
 0x342   :  { %v232_v62 = vmul.f32 %v231_v61, %v231_v61 }
 0x344   :  { %234 = vrot.lane.b32.xlu1 %v232_v62, %s370_s21 }
 0x348   :  { %255 = vrot.lane.b32.xlu1 %v251_v63, %s370_s21 }
 0x3b6   :  { %v235_v0 = vpop.permute.xlu1 %234 }
 0x3b7   :  { %v237_v1 = vsel %vm99_vm3, %v231_v61, %v235_v0 }
 0x3b8   :  { %v238_v2 = vrot.slane %v237_v1, 4 }
 0x3ba   :  { %v239_v3 = vadd.f32 %v238_v2, %v237_v1  ;;  %v256_v13 = vpop.permute.xlu1 %255 }
 0x3bc   :  { %v240_v4 = vrot.slane %v239_v3, 2 }
 0x3be   :  { %v241_v5 = vadd.f32 %v240_v4, %v239_v3 }
 0x3c0   :  { %v242_v6 = vrot.slane %v241_v5, 1 }
 0x3c2   :  { %v243_v7 = vadd.f32 %v242_v6, %v241_v5 }
 0x3c4   :  { %v244_v8 = vmul.f32 0.125, %v243_v7 }
 0x3c6   :  { %v245_v9 = vmul.f32 %v244_v8, %v244_v8  ;;  %v259_v17 = vsub.f32 %v231_v61, %v244_v8 }
 0x3c8   :  { %247 = vrot.lane.b32.xlu0 %v245_v9, %s370_s21 }
 0x43a   :  { %v248_v10 = vpop.permute.xlu0 %247 }
 0x43b   :  { %v250_v11 = vsub.f32 %v244_v8, %v248_v10 }
 0x43d   :  { %v252_v12 = vadd.f32 1e-05, %v250_v11 }
 0x43f   :  { %363 = vrsqrt.f32 %v252_v12 }
 0x449   :  { %v364_v14 = vpop.eup %363 }
 0x44a   :  { %v258_v15 = vmul.f32 %v364_v14, %v256_v13 }
 0x44c   :  { %v263_v16 = vrot.slane %v258_v15, %v125_v44 }
 0x44e   :  { %265 = vrot.lane.b32.xlu0 %v263_v16, %s370_s21 }
 0x4c0   :  { %v266_v18 = vpop.permute.xlu0 %265 }
 0x4c1   :  { %v268_v19 = vmul.f32 %v266_v18, %v259_v17 }
 0x4c3   :  { %v269_v20 = vsel %vm99_vm3, %v268_v19, 0.0 }
 0x4c4   :  { %270 = vadd.xlane.f32.xlu1 %v269_v20 }
 0x551   :  { %v271_v22 = vpop.xlane.xlu1 %270 }
 0x552   :  { %v277_v23 = vadd.f32 %v291_v21, %v271_v22 }
 0x554   :  { %v278_v24 = vmul.f32 0.5, %v277_v23 }
 0x556   :  { %365 = vtanh.f32 %v278_v24 }
 0x560   :  { %v366_v25 = vpop.eup %365 }
 0x561   :  { %v280_v26 = vadd.f32 1.0, %v366_v25 }
 0x563   :  { %v281_v27 = vmul.f32 0.5, %v280_v26 }
 0x565   :  { %283 = vst.msk [vmem:[%s467_s2] sm:$0xff] %vm282_vm5, %v281_v27 }

</bundles_post_ra>
